<compile_context>
chip_gen: v7x
topology: tpu7x:2x2x1
jax: 0.10.0
libtpu: 0.0.40
codegen_flags: <defaults>
</compile_context>

<pallas_src>
import jax
import jax.numpy as jnp
from jax import lax
from jax.experimental import pallas as pl
from jax.experimental.pallas import tpu as pltpu

# ---- module-consistent (small) shapes -------------------------------------
B, C_IN, H, W = 2, 3, 16, 16          # input image batch (NCHW)
C_OUT = 8                             # stem output channels (small synthetic)
KH = KW = 7
STRIDE, PAD = 2, 3
HO = (H + 2 * PAD - KH) // STRIDE + 1            # 8
WO = (W + 2 * PAD - KW) // STRIDE + 1            # 8
POOL_K, POOL_S, POOL_P = 3, 2, 1
HP = (HO + 2 * POOL_P - POOL_K) // POOL_S + 1    # 4
WP = (WO + 2 * POOL_P - POOL_K) // POOL_S + 1    # 4
KFEAT = KH * KW * C_IN                           # 147 (im2col feature length)
KPAD = 256                                       # zero-padded K (clean lanes)
M_ROWS = B * HO * WO                             # 128 (matmul M, batch folded)
BN_EPS = 1e-5


# ---- Pallas kernel: conv-as-matmul + folded-BN + ReLU + slab maxpool -------
def resbottom_kernel(patch_ref, w_ref, shift_ref, out_ref):
    # patch_ref: (M_ROWS, KPAD) bf16, rows ordered (b, w%2, w//2, h%2, h//2)
    # w_ref:     (KPAD, C_OUT)  bf16, BN scale pre-folded into the columns
    # shift_ref: (1, C_OUT)     f32 folded BN shift
    # out_ref:   (B, WP, HP, C_OUT) f32, indexed [b, j, i, c]
    y = jnp.dot(patch_ref[...], w_ref[...],
                preferred_element_type=jnp.float32)          # (128, C) on MXU
    y = jnp.maximum(y + shift_ref[...], 0.0)                 # BN shift + ReLU

    # ---- MaxPool2d(3, stride 2, pad 1) as whole-slab maxima ----------------
    # Row r of y = conv[b, h, w] with r = ((((b*2+pw)*WP + q)*2 + ph)*HP + ih),
    # where w = 2q + pw and h = 2*ih + ph.  Pool window (i, j) covers
    #   w in {2j-1, 2j, 2j+1}  x  h in {2i-1, 2i, 2i+1}
    # = {odd[q=j-1], even[q=j], odd[q=j]} x {odd_h[i-1], even_h[i], odd_h[i]}.
    # Post-ReLU values are >= 0 and every window has >= 1 valid tap, so the
    # out-of-range ("padding") taps can be replaced by 0.
    y5 = y.reshape(B, 2, WP, 2 * HP, C_OUT)      # layout-preserving split
    ev = y5[:, 0]                                # (B, WP, 2*HP, C): w = 2q
    od = y5[:, 1]                                #                   w = 2q+1
    od_prev = jnp.concatenate(                   # odd col at q-1 (0 at q == 0)
        [jnp.zeros((B, 1, 2 * HP, C_OUT), jnp.float32), od[:, :WP - 1]],
        axis=1)
    wmax = jnp.maximum(jnp.maximum(ev, od), od_prev)   # (B, WP, 2*HP, C)

    # minor 2*HP axis index is (h % 2)*HP + h//2: [0:HP] even rows, [HP:] odd.
    h_even = wmax[:, :, 0:HP, :]                       # h = 2i
    h_odd = wmax[:, :, HP:2 * HP, :]                   # h = 2i + 1
    h_odd_prev = wmax[:, :, HP - 1:2 * HP - 1, :]      # h = 2i - 1 for i >= 1
    row_i = lax.broadcasted_iota(jnp.int32, (B, WP, HP, C_OUT), 2)
    h_odd_prev = jnp.where(row_i == 0, 0.0, h_odd_prev)   # mask i == 0 tap

    out_ref[...] = jnp.maximum(jnp.maximum(h_even, h_odd), h_odd_prev)


# ---- wrapper (glue: im2col + reordering, BN folding, layout) ---------------
def resbottom_forward(x_nchw, conv_w, gamma, beta, mean, var):
    # im2col with pooling-friendly row ordering (plain-JAX glue, outside kernel)
    x = jnp.transpose(x_nchw, (0, 2, 3, 1))                  # NCHW -> NHWC
    xp = jnp.pad(x, ((0, 0), (PAD, PAD), (PAD, PAD), (0, 0)))
    slabs = []
    for kh in range(KH):
        for kw in range(KW):
            slabs.append(
                xp[:, kh:kh + STRIDE * (HO - 1) + 1:STRIDE,
                      kw:kw + STRIDE * (WO - 1) + 1:STRIDE, :])
    patches = jnp.stack(slabs, axis=3)                       # (B,HO,WO,KH*KW,C)
    patches = patches.reshape(B, HO, WO, KFEAT)
    # rows -> (b, w%2, w//2, h%2, h//2) so stride-2 pool windows become slabs
    patches = patches.reshape(B, HP, 2, WP, 2, KFEAT)        # (b,ih,ph,q,pw,f)
    patches = jnp.transpose(patches, (0, 4, 3, 2, 1, 5))     # (b,pw,q,ph,ih,f)
    patches = patches.reshape(M_ROWS, KFEAT)
    patches = jnp.pad(patches, ((0, 0), (0, KPAD - KFEAT)))  # K -> 256
    patches = patches.astype(jnp.bfloat16)

    # fold BN into weights (scale) and a shift; conv_w is OIHW, (kh,kw,c) order
    inv_std = 1.0 / jnp.sqrt(var + BN_EPS)
    scale = gamma * inv_std                                  # (C_OUT,)
    shift = (beta - mean * scale).reshape(1, C_OUT).astype(jnp.float32)
    w_mat = jnp.transpose(conv_w, (2, 3, 1, 0)).reshape(KFEAT, C_OUT)
    w_mat = w_mat * scale[None, :]                           # fold BN scale
    w_mat = jnp.pad(w_mat, ((0, KPAD - KFEAT), (0, 0))).astype(jnp.bfloat16)

    vmem = pltpu.MemorySpace.VMEM
    pooled = pl.pallas_call(                                 # single invocation
        resbottom_kernel,
        out_shape=jax.ShapeDtypeStruct((B, WP, HP, C_OUT), jnp.float32),
        in_specs=[pl.BlockSpec(memory_space=vmem)] * 3,
        out_specs=pl.BlockSpec(memory_space=vmem),
    )(patches, w_mat, shift)                                 # [b, j, i, c]

    return jnp.transpose(pooled, (0, 3, 2, 1))               # NCHW [b, c, i, j]


# ---- pure-JAX reference (for correctness check) ----------------------------
def resbottom_reference(x_nchw, conv_w, gamma, beta, mean, var):
    y = lax.conv_general_dilated(
        x_nchw, conv_w, window_strides=(STRIDE, STRIDE),
        padding=((PAD, PAD), (PAD, PAD)),
        dimension_numbers=("NCHW", "OIHW", "NCHW"))
    inv_std = 1.0 / jnp.sqrt(var + BN_EPS)
    s = (gamma * inv_std).reshape(1, C_OUT, 1, 1)
    t = (beta - mean * gamma * inv_std).reshape(1, C_OUT, 1, 1)
    y = jnp.maximum(y * s + t, 0.0)
    y = lax.reduce_window(
        y, -jnp.inf, lax.max,
        window_dimensions=(1, 1, POOL_K, POOL_K),
        window_strides=(1, 1, POOL_S, POOL_S),
        padding=((0, 0), (0, 0), (POOL_P, POOL_P), (POOL_P, POOL_P)))
    return y


if __name__ == "__main__":
    key = jax.random.PRNGKey(0)
    kx, kw, kg, kb, km, kv = jax.random.split(key, 6)

    x = jax.random.normal(kx, (B, C_IN, H, W), dtype=jnp.float32)
    conv_w = jax.random.normal(kw, (C_OUT, C_IN, KH, KW), dtype=jnp.float32) * 0.05
    gamma = 1.0 + 0.1 * jax.random.normal(kg, (C_OUT,), dtype=jnp.float32)
    beta = 0.1 * jax.random.normal(kb, (C_OUT,), dtype=jnp.float32)
    mean = 0.1 * jax.random.normal(km, (C_OUT,), dtype=jnp.float32)
    var = 0.5 + jnp.abs(jax.random.normal(kv, (C_OUT,), dtype=jnp.float32))

    out = resbottom_forward(x, conv_w, gamma, beta, mean, var)
    out = jax.block_until_ready(out)

    ref = resbottom_reference(x, conv_w, gamma, beta, mean, var)
    assert out.shape == (B, C_OUT, HP, WP), out.shape
    # bf16 matmul operands (f32 accumulation) -> loosened tolerance.
    assert jnp.allclose(out, ref, atol=5e-2, rtol=5e-2), float(
        jnp.max(jnp.abs(out - ref)))

    print("KERNEL_OK")
</pallas_src>

<mosaic_0001>
module attributes {stable_mosaic.version = 11 : i64} {
  func.func @resbottom_kernel(%arg0: memref<128x256xbf16, #tpu.memory_space<vmem>>, %arg1: memref<256x8xbf16, #tpu.memory_space<vmem>>, %arg2: memref<1x8xf32, #tpu.memory_space<vmem>>, %arg3: memref<2x4x4x8xf32, #tpu.memory_space<vmem>>) attributes {dimension_semantics = [], scalar_prefetch = 0 : i64, scratch_operands = 0 : i64, tpu.core_type = #tpu.core_type<tc>} {
    %c0 = arith.constant 0 : index
    %c0_0 = arith.constant 0 : index
    %0 = vector.load %arg0[%c0, %c0_0] : memref<128x256xbf16, #tpu.memory_space<vmem>>, vector<128x256xbf16>
    %c0_1 = arith.constant 0 : index
    %c0_2 = arith.constant 0 : index
    %1 = vector.load %arg1[%c0_1, %c0_2] : memref<256x8xbf16, #tpu.memory_space<vmem>>, vector<256x8xbf16>
    %cst = arith.constant dense<0.000000e+00> : vector<128x8xf32>
    %2 = tpu.matmul %0, %1, %cst {dimension_numbers = #tpu.dot_dimension_numbers<[1], [0], [0], [1], [0, 0, 1, 1], [], []>} : vector<128x256xbf16>, vector<256x8xbf16>, vector<128x8xf32> -> vector<128x8xf32>
    %c0_3 = arith.constant 0 : index
    %c0_4 = arith.constant 0 : index
    %3 = vector.load %arg2[%c0_3, %c0_4] : memref<1x8xf32, #tpu.memory_space<vmem>>, vector<1x8xf32>
    %4 = vector.broadcast %3 : vector<1x8xf32> to vector<128x8xf32>
    %5 = arith.addf %2, %4 : vector<128x8xf32>
    %cst_5 = arith.constant 0.000000e+00 : f32
    %6 = vector.broadcast %cst_5 : f32 to vector<128x8xf32>
    %7 = arith.maximumf %5, %6 : vector<128x8xf32>
    %8 = vector.shape_cast %7 : vector<128x8xf32> to vector<2x2x4x8x8xf32>
    %9 = vector.extract_strided_slice %8 {offsets = [0, 0, 0, 0, 0], sizes = [2, 1, 4, 8, 8], strides = [1, 1, 1, 1, 1]} : vector<2x2x4x8x8xf32> to vector<2x1x4x8x8xf32>
    %10 = vector.shape_cast %9 : vector<2x1x4x8x8xf32> to vector<2x4x8x8xf32>
    %11 = vector.extract_strided_slice %8 {offsets = [0, 1, 0, 0, 0], sizes = [2, 1, 4, 8, 8], strides = [1, 1, 1, 1, 1]} : vector<2x2x4x8x8xf32> to vector<2x1x4x8x8xf32>
    %12 = vector.shape_cast %11 : vector<2x1x4x8x8xf32> to vector<2x4x8x8xf32>
    %cst_6 = arith.constant 0.000000e+00 : f32
    %13 = vector.broadcast %cst_6 : f32 to vector<2x1x8x8xf32>
    %14 = vector.extract_strided_slice %12 {offsets = [0, 0, 0, 0], sizes = [2, 3, 8, 8], strides = [1, 1, 1, 1]} : vector<2x4x8x8xf32> to vector<2x3x8x8xf32>
    %15 = tpu.concatenate %13, %14 in 1 : vector<2x1x8x8xf32>, vector<2x3x8x8xf32> -> vector<2x4x8x8xf32>
    %16 = arith.maximumf %10, %12 : vector<2x4x8x8xf32>
    %17 = arith.maximumf %16, %15 : vector<2x4x8x8xf32>
    %18 = vector.extract_strided_slice %17 {offsets = [0, 0, 0, 0], sizes = [2, 4, 4, 8], strides = [1, 1, 1, 1]} : vector<2x4x8x8xf32> to vector<2x4x4x8xf32>
    %19 = vector.extract_strided_slice %17 {offsets = [0, 0, 4, 0], sizes = [2, 4, 4, 8], strides = [1, 1, 1, 1]} : vector<2x4x8x8xf32> to vector<2x4x4x8xf32>
    %20 = vector.extract_strided_slice %17 {offsets = [0, 0, 3, 0], sizes = [2, 4, 4, 8], strides = [1, 1, 1, 1]} : vector<2x4x8x8xf32> to vector<2x4x4x8xf32>
    %21 = tpu.iota {dimensions = array<i32: 2>} : vector<2x4x4x8xi32>
    %c0_i32 = arith.constant 0 : i32
    %22 = vector.broadcast %c0_i32 : i32 to vector<2x4x4x8xi32>
    %23 = arith.cmpi eq, %21, %22 : vector<2x4x4x8xi32>
    %cst_7 = arith.constant 0.000000e+00 : f32
    %24 = vector.broadcast %cst_7 : f32 to vector<2x4x4x8xf32>
    %25 = arith.select %23, %24, %20 : vector<2x4x4x8xi1>, vector<2x4x4x8xf32>
    %26 = arith.maximumf %18, %19 : vector<2x4x4x8xf32>
    %27 = arith.maximumf %26, %25 : vector<2x4x4x8xf32>
    %c0_8 = arith.constant 0 : index
    %c0_9 = arith.constant 0 : index
    %c0_10 = arith.constant 0 : index
    %c0_11 = arith.constant 0 : index
    %28 = vector.load %arg3[%c0_8, %c0_9, %c0_10, %c0_11] : memref<2x4x4x8xf32, #tpu.memory_space<vmem>>, vector<2x4x4x8xf32>
    tpu.vector_store %arg3[%c0_8, %c0_9, %c0_10, %c0_11], %27 {strides = array<i32>} : memref<2x4x4x8xf32, #tpu.memory_space<vmem>>, vector<2x4x4x8xf32>,
    return
  }
}

</mosaic_0001>

<bundles_post_ra>
// kernel: tpu_custom_call.1
= control target key start
LH: loop header
LB: loop body
LE: loop exit
PB: predicated region body
PF: predicated region fallthrough
CT: control target
= control target key end

     0   :  { %s839_s0 = inlined_call_operand.vmem [shape: bf16[128,256], index: 0, kind: input, shape index: {}]   ;;  %s840_s1 = inlined_call_operand.vmem [shape: bf16[256,8], index: 1, kind: input, shape index: {}]   ;;  %s841_s2 = inlined_call_operand.vmem [shape: f32[1,8], index: 2, kind: input, shape index: {}]   ;;  %s842_s3 = inlined_call_operand.hbm [shape: f32[2,4,4,8], index: 3, kind: output, shape index: {}]  }
   0x1   :  { %v584_v0 = vld [vmem:[%s840_s1 + $0x40] sm:$0xff]   ;;  %v586_v2 = vld [vmem:[%s840_s1 + $0x48] sm:$0xff]   ;;  %v588_v4 = vld [vmem:[%s840_s1 + $0x50] sm:$0xff]  }
   0x2   :  { %v585_v1 = vld [vmem:[%s840_s1] sm:$0xff]   ;;  %501 = vmatprep.subr.bf16.mxu0 %v584_v0  ;;  %565 = vmatprep.subr.bf16.mxu1 %v584_v0  ;;  %v587_v3 = vld [vmem:[%s840_s1 + $0x8] sm:$0xff]   ;;  %v589_v5 = vld [vmem:[%s840_s1 + $0x10] sm:$0xff]  }
   0x3   :  { %502 = vmatpush3.bf16.msra.mxu0 %v585_v1  ;;  %573 = vmatpush3.bf16.msra.mxu1 %v585_v1  ;;  %v590_v6 = vld [vmem:[%s840_s1 + $0x58] sm:$0xff]   ;;  %v592_v8 = vld [vmem:[%s840_s1 + $0x60] sm:$0xff]   ;;  %v594_v10 = vld [vmem:[%s840_s1 + $0x68] sm:$0xff]  }
   0x4   :  { %503 = vmatprep.subr.bf16.mxu0 %v586_v2  ;;  %566 = vmatprep.subr.bf16.mxu1 %v586_v2  ;;  %v591_v7 = vld [vmem:[%s840_s1 + $0x18] sm:$0xff]   ;;  %v593_v9 = vld [vmem:[%s840_s1 + $0x20] sm:$0xff]   ;;  %v595_v13 = vld [vmem:[%s840_s1 + $0x28] sm:$0xff]  }
   0x5   :  { %v602_v11 = vld [vmem:[%s839_s0 + $0x4] ss:$8 sps:$4 sm:$0xff]   ;;  %v596_v14 = vld [vmem:[%s840_s1 + $0x70] sm:$0xff]   ;;  %v598_v16 = vld [vmem:[%s840_s1 + $0x78] sm:$0xff]  }
   0x6   :  { %v605_v12 = vld [vmem:[%s839_s0 + $0x44] ss:$8 sps:$4 sm:$0xff]   ;;  %279 = vmatprep.mubr.bf16.mxu0 %v602_v11  ;;  %v597_v15 = vld [vmem:[%s840_s1 + $0x30] sm:$0xff]  }
   0x7   :  { %504 = vmatpush3.bf16.msra.mxu0 %v587_v3  ;;  %574 = vmatpush3.bf16.msra.mxu1 %v587_v3 }
   0x8   :  { %505 = vmatprep.subr.bf16.mxu0 %v588_v4  ;;  %567 = vmatprep.subr.bf16.mxu1 %v588_v4 }
   0x9   :  { %311 = vmatprep.mubr.bf16.mxu1 %v605_v12 }
   0xb   :  { %506 = vmatpush3.bf16.msra.mxu0 %v589_v5  ;;  %575 = vmatpush3.bf16.msra.mxu1 %v589_v5 }
   0xc   :  { %507 = vmatprep.subr.bf16.mxu0 %v590_v6  ;;  %568 = vmatprep.subr.bf16.mxu1 %v590_v6 }
   0xf   :  { %508 = vmatpush3.bf16.msra.mxu0 %v591_v7  ;;  %576 = vmatpush3.bf16.msra.mxu1 %v591_v7 }
  0x10   :  { %509 = vmatprep.subr.bf16.mxu0 %v592_v8  ;;  %569 = vmatprep.subr.bf16.mxu1 %v592_v8 }
  0x13   :  { %510 = vmatpush3.bf16.msra.mxu0 %v593_v9  ;;  %577 = vmatpush3.bf16.msra.mxu1 %v593_v9 }
  0x14   :  { %511 = vmatprep.subr.bf16.mxu0 %v594_v10  ;;  %570 = vmatprep.subr.bf16.mxu1 %v594_v10 }
  0x17   :  { %512 = vmatpush3.bf16.msra.mxu0 %v595_v13  ;;  %578 = vmatpush3.bf16.msra.mxu1 %v595_v13 }
  0x18   :  { %513 = vmatprep.subr.bf16.mxu0 %v596_v14  ;;  %571 = vmatprep.subr.bf16.mxu1 %v596_v14 }
  0x19   :  { %8 = vsyncpa [#allocation3], 0  ;;  %v599_v17 = vld [vmem:[%s840_s1 + $0x38] sm:$0xff]   ;;  %v600_v18 = vld [vmem:[%s839_s0] ss:$8 sps:$4 sm:$0xff]   ;;  %v376_v62 = vlaneseq  ;;  %vm443_vm1 = vcmask 60416  }
  0x1a   :  { %v603_v19 = vld [vmem:[%s839_s0 + $0x40] ss:$8 sps:$4 sm:$0xff]   ;;  %v606_v20 = vld [vmem:[%s839_s0 + $0x14] ss:$8 sps:$4 sm:$0xff]   ;;  %v610_v22 = vld [vmem:[%s839_s0 + $0x10] ss:$8 sps:$4 sm:$0xff]  }
  0x1b   :  { %514 = vmatpush3.bf16.msra.mxu0 %v597_v15  ;;  %579 = vmatpush3.bf16.msra.mxu1 %v597_v15  ;;  %v608_v21 = vld [vmem:[%s839_s0 + $0x54] ss:$8 sps:$4 sm:$0xff]   ;;  %v611_v23 = vld [vmem:[%s839_s0 + $0x50] ss:$8 sps:$4 sm:$0xff]   ;;  %v612_v24 = vld [vmem:[%s839_s0 + $0x24] ss:$8 sps:$4 sm:$0xff]  }
  0x1c   :  { %515 = vmatprep.subr.bf16.mxu0 %v598_v16  ;;  %572 = vmatprep.subr.bf16.mxu1 %v598_v16  ;;  %v614_v25 = vld [vmem:[%s839_s0 + $0x64] ss:$8 sps:$4 sm:$0xff]   ;;  %v616_v26 = vld [vmem:[%s839_s0 + $0x20] ss:$8 sps:$4 sm:$0xff]   ;;  %v618_v28 = vld [vmem:[%s839_s0 + $0x34] ss:$8 sps:$4 sm:$0xff]  }
  0x1d   :  { %v617_v27 = vld [vmem:[%s839_s0 + $0x60] ss:$8 sps:$4 sm:$0xff]   ;;  %v620_v29 = vld [vmem:[%s839_s0 + $0x74] ss:$8 sps:$4 sm:$0xff]   ;;  %v622_v30 = vld [vmem:[%s839_s0 + $0x30] ss:$8 sps:$4 sm:$0xff]  }
  0x1e   :  { %v623_v31 = vld [vmem:[%s839_s0 + $0x70] ss:$8 sps:$4 sm:$0xff]   ;;  %v774_v56 = vld [vmem:[%s841_s2] ss:$0 sm:$0xff]  ;;  %v782_v14 = vshrl.u32 %v376_v62, 7  ;;  %s648_s2 = smov [#allocation2]  }
  0x1f   :  { %516 = vmatpush3.bf16.msra.mxu0 %v599_v17  ;;  %580 = vmatpush3.bf16.msra.mxu1 %v599_v17  ;;  %s457_s22 = sshll.u32 %s648_s2, 4  ;;  %s458_s22 = int_to_ptr.vmem [resolvable:$true] %s457_s22 }
  0x20   :  { %vm378_vm0 = vcmp.eq.s32.totalorder %v782_v14, 0  ;;  %s624_s23 = scalar_lea.vmem %s458_s22, 512  ;;  %p629_p1 = scmp.lt.s32.totalorder %s458_s22, %s458_s22 }
  0x21   :  { %p625_p0 = scmp.ne.s32.totalorder %s458_s22, %s624_s23  ;;  %p630_p2 = scmp.lt.s32.totalorder %s624_s23, %s624_s23 }
  0x22   :  { %280 = vmatmul.mubr.bf16.vlgmr.msra.gmra.mrb[0].mxu0 %v600_v18  ;;  %312 = vmatmul.mubr.bf16.vlgmr.msra.gmra.mrb[0].mxu1 %v603_v19 }
  0x23   :  { %287 = vmatprep.mubr.bf16.mxu0 %v606_v20  ;;  %319 = vmatprep.mubr.bf16.mxu1 %v608_v21  ;;  %p631_p3 = por %p630_p2, %p629_p1 }
  0x25   :  { %p632_p4 = pnand %p631_p3, %p625_p0 }
  0x2a   :  { %288 = vmatmul.mubr.bf16.gmra.mrb[4].mxu0 %v610_v22  ;;  %320 = vmatmul.mubr.bf16.gmra.mrb[4].mxu1 %v611_v23 }
  0x2b   :  { %295 = vmatprep.mubr.bf16.mxu0 %v612_v24  ;;  %327 = vmatprep.mubr.bf16.mxu1 %v614_v25 }
  0x32   :  { %296 = vmatmul.mubr.bf16.gmra.mrb[8].mxu0 %v616_v26  ;;  %328 = vmatmul.mubr.bf16.gmra.mrb[8].mxu1 %v617_v27 }
  0x33   :  { %303 = vmatprep.mubr.bf16.mxu0 %v618_v28  ;;  %335 = vmatprep.mubr.bf16.mxu1 %v620_v29 }
  0x3a   :  { %304 = vmatmul.mubr.bf16.gmra.mrb[12].mxu0 %v622_v30  ;;  %336 = vmatmul.mubr.bf16.gmra.mrb[12].mxu1 %v623_v31 }
  0xf5   :  { %v517_v32 = vpop.f32.mrb[0].mxu0  ;;  %v541_v33 = vpop.f32.mrb[0].mxu1 }
  0xf6   :  { %v518_v34 = vpop.f32.mrb[1].mxu0  ;;  %v542_v35 = vpop.f32.mrb[1].mxu1 }
  0xf7   :  { %v519_v36 = vadd.f32 %v518_v34, %v517_v32  ;;  %v543_v37 = vadd.f32 %v542_v35, %v541_v33  ;;  %v520_v38 = vpop.f32.mrb[2].mxu0  ;;  %v544_v39 = vpop.f32.mrb[2].mxu1 }
  0xf8   :  { %v521_v40 = vpop.f32.mrb[3].mxu0  ;;  %v545_v41 = vpop.f32.mrb[3].mxu1 }
  0xf9   :  { %v522_v42 = vadd.f32 %v521_v40, %v520_v38  ;;  %v546_v43 = vadd.f32 %v545_v41, %v544_v39  ;;  %v282_v59 = vadd.f32 %v519_v36, %v774_v56  ;;  %v314_v60 = vadd.f32 %v543_v37, %v774_v56 }
  0xfb   :  { %v285_v4 = vadd.f32 %v522_v42, %v774_v56  ;;  %v317_v5 = vadd.f32 %v546_v43, %v774_v56  ;;  %v344_v12 = vmax.f32 %v282_v59, 0.0  ;;  %v352_v13 = vmax.f32 %v314_v60, 0.0 }
  0xfd   :  { %v523_v44 = vpop.f32.mrb[4].mxu0  ;;  %v547_v45 = vpop.f32.mrb[4].mxu1  ;;  %v345_v19 = vmax.f32 %v285_v4, 0.0  ;;  %v353_v20 = vmax.f32 %v317_v5, 0.0 }
  0xfe   :  { %v524_v46 = vpop.f32.mrb[5].mxu0  ;;  %v548_v47 = vpop.f32.mrb[5].mxu1 }
  0xff   :  { %v525_v48 = vadd.f32 %v524_v46, %v523_v44  ;;  %v549_v49 = vadd.f32 %v548_v47, %v547_v45  ;;  %v526_v50 = vpop.f32.mrb[6].mxu0  ;;  %v550_v51 = vpop.f32.mrb[6].mxu1 }
 0x100   :  { %v527_v52 = vpop.f32.mrb[7].mxu0  ;;  %v551_v53 = vpop.f32.mrb[7].mxu1 }
 0x101   :  { %v767_v54 = vadd.f32 %v527_v52, %v526_v50  ;;  %v769_v55 = vadd.f32 %v551_v53, %v550_v51  ;;  %v290_v21 = vadd.f32 %v525_v48, %v774_v56  ;;  %v322_v22 = vadd.f32 %v549_v49, %v774_v56 }
 0x103   :  { %v346_v37 = vmax.f32 %v290_v21, 0.0  ;;  %v354_v38 = vmax.f32 %v322_v22, 0.0 }
 0x105   :  { %v529_v57 = vpop.f32.mrb[8].mxu0  ;;  %v553_v58 = vpop.f32.mrb[8].mxu1 }
 0x106   :  { %v530_v61 = vpop.f32.mrb[9].mxu0  ;;  %v554_v63 = vpop.f32.mrb[9].mxu1 }
 0x107   :  { %v531_v0 = vadd.f32 %v530_v61, %v529_v57  ;;  %v555_v1 = vadd.f32 %v554_v63, %v553_v58  ;;  %v532_v2 = vpop.f32.mrb[10].mxu0  ;;  %v556_v3 = vpop.f32.mrb[10].mxu1 }
 0x108   :  { %v533_v6 = vpop.f32.mrb[11].mxu0  ;;  %v557_v7 = vpop.f32.mrb[11].mxu1 }
 0x109   :  { %v298_v8 = vadd.f32 %v531_v0, %v774_v56  ;;  %v330_v9 = vadd.f32 %v555_v1, %v774_v56  ;;  %v534_v10 = vadd.f32 %v533_v6, %v532_v2  ;;  %v558_v11 = vadd.f32 %v557_v7, %v556_v3 }
 0x10b   :  { %v348_v15 = vmax.f32 %v298_v8, 0.0  ;;  %v356_v16 = vmax.f32 %v330_v9, 0.0  ;;  %v785_v17 = vadd.f32 %v534_v10, %v774_v56  ;;  %v788_v18 = vadd.f32 %v558_v11, %v774_v56 }
 0x10c   :  { %v293_v10 = vadd.f32 %v767_v54, %v774_v56  ;;  %v325_v11 = vadd.f32 %v769_v55, %v774_v56 }
 0x10d   :  { %v360_v23 = vmax.f32 %v344_v12, %v348_v15  ;;  %v364_v24 = vmax.f32 %v352_v13, %v356_v16  ;;  %v349_v25 = vmax.f32 %v785_v17, 0.0  ;;  %v357_v26 = vmax.f32 %v788_v18, 0.0  ;;  %v535_v27 = vpop.f32.mrb[12].mxu0  ;;  %v559_v28 = vpop.f32.mrb[12].mxu1 }
 0x10e   :  { %v536_v29 = vpop.f32.mrb[13].mxu0  ;;  %v560_v30 = vpop.f32.mrb[13].mxu1  ;;  %v347_v54 = vmax.f32 %v293_v10, 0.0 }
 0x10f   :  { %v368_v31 = vmax.f32 %v360_v23, 0.0  ;;  %v372_v32 = vmax.f32 %v364_v24, 0.0  ;;  %v361_v33 = vmax.f32 %v345_v19, %v349_v25  ;;  %v365_v34 = vmax.f32 %v353_v20, %v357_v26  ;;  %v538_v35 = vpop.f32.mrb[14].mxu0  ;;  %v562_v36 = vpop.f32.mrb[14].mxu1 }
 0x110   :  { %v537_v39 = vadd.f32 %v536_v29, %v535_v27  ;;  %v561_v40 = vadd.f32 %v560_v30, %v559_v28  ;;  %v539_v41 = vpop.f32.mrb[15].mxu0  ;;  %v563_v42 = vpop.f32.mrb[15].mxu1  ;;  %v355_v23 = vmax.f32 %v325_v11, 0.0 }
 0x111   :  { %v387_v43 = vrot.slane %v368_v31, 3  ;;  %v411_v44 = vrot.slane %v368_v31, 4  ;;  %v391_v45 = vrot.slane %v372_v32, 3  ;;  %v415_v46 = vrot.slane %v372_v32, 4 }
 0x112   :  { %v369_v47 = vmax.f32 %v361_v33, %v348_v15  ;;  %v373_v48 = vmax.f32 %v365_v34, %v356_v16  ;;  %v306_v49 = vadd.f32 %v537_v39, %v774_v56  ;;  %v338_v50 = vadd.f32 %v561_v40, %v774_v56 }
 0x113   :  { %v403_v51 = vsel %vm378_vm0, 0.0, %v387_v43  ;;  %v427_v52 = vmax.f32 %v368_v31, %v411_v44  ;;  %v407_v53 = vsel %vm378_vm0, 0.0, %v391_v45  ;;  %v431_v57 = vmax.f32 %v372_v32, %v415_v46 }
 0x114   :  { %v388_v58 = vrot.slane %v369_v47, 3  ;;  %v412_v59 = vrot.slane %v369_v47, 4  ;;  %v392_v60 = vrot.slane %v373_v48, 3  ;;  %v416_v61 = vrot.slane %v373_v48, 4 }
 0x115   :  { %v435_v62 = vmax.f32 %v427_v52, %v403_v51  ;;  %v439_v63 = vmax.f32 %v431_v57, %v407_v53  ;;  %v350_v0 = vmax.f32 %v306_v49, 0.0  ;;  %v358_v1 = vmax.f32 %v338_v50, 0.0 }
 0x116   :  { %v404_v2 = vsel %vm378_vm0, 0.0, %v388_v58  ;;  %v428_v3 = vmax.f32 %v369_v47, %v412_v59  ;;  %v408_v4 = vsel %vm378_vm0, 0.0, %v392_v60  ;;  %v432_v5 = vmax.f32 %v373_v48, %v416_v61 }
 0x117   :  { %444 = vst.msk [vmem:[#allocation2] sm:$0xf] %vm443_vm1, %v435_v62  ;;  %448 = vst.msk [vmem:[#allocation2 + $0x10] sm:$0xf] %vm443_vm1, %v439_v63  ;;  %v362_v6 = vmax.f32 %v346_v37, %v350_v0  ;;  %v366_v7 = vmax.f32 %v354_v38, %v358_v1  ;;  %v540_v8 = vadd.f32 %v539_v41, %v538_v35 }
 0x118   :  { %v564_v9 = vadd.f32 %v563_v42, %v562_v36  ;;  %v436_v12 = vmax.f32 %v428_v3, %v404_v2  ;;  %v440_v13 = vmax.f32 %v432_v5, %v408_v4 }
 0x119   :  { %v370_v15 = vmax.f32 %v362_v6, %v349_v25  ;;  %v374_v16 = vmax.f32 %v366_v7, %v357_v26  ;;  %v309_v17 = vadd.f32 %v540_v8, %v774_v56 }
 0x11a   :  { %v341_v18 = vadd.f32 %v564_v9, %v774_v56  ;;  %445 = vst.msk [vmem:[#allocation2 + $0x4] sm:$0xf] %vm443_vm1, %v436_v12  ;;  %449 = vst.msk [vmem:[#allocation2 + $0x14] sm:$0xf] %vm443_vm1, %v440_v13 }
 0x11b   :  { %v389_v19 = vrot.slane %v370_v15, 3  ;;  %v413_v20 = vrot.slane %v370_v15, 4  ;;  %v393_v21 = vrot.slane %v374_v16, 3  ;;  %v417_v22 = vrot.slane %v374_v16, 4 }
 0x11c   :  { %v351_v24 = vmax.f32 %v309_v17, 0.0  ;;  %v359_v55 = vmax.f32 %v341_v18, 0.0 }
 0x11d   :  { %v405_v25 = vsel %vm378_vm0, 0.0, %v389_v19  ;;  %v429_v26 = vmax.f32 %v370_v15, %v413_v20  ;;  %v409_v27 = vsel %vm378_vm0, 0.0, %v393_v21  ;;  %v433_v56 = vmax.f32 %v374_v16, %v417_v22 }
 0x11e   :  { %v363_v28 = vmax.f32 %v347_v54, %v351_v24  ;;  %v367_v29 = vmax.f32 %v355_v23, %v359_v55 }
 0x11f   :  { %v437_v30 = vmax.f32 %v429_v26, %v405_v25  ;;  %v441_v31 = vmax.f32 %v433_v56, %v409_v27 }
 0x120   :  { %v371_v32 = vmax.f32 %v363_v28, %v350_v0  ;;  %v375_v33 = vmax.f32 %v367_v29, %v358_v1 }
 0x121   :  { %446 = vst.msk [vmem:[#allocation2 + $0x8] sm:$0xf] %vm443_vm1, %v437_v30  ;;  %450 = vst.msk [vmem:[#allocation2 + $0x18] sm:$0xf] %vm443_vm1, %v441_v31 }
 0x122   :  { %v390_v34 = vrot.slane %v371_v32, 3  ;;  %v414_v35 = vrot.slane %v371_v32, 4  ;;  %v394_v36 = vrot.slane %v375_v33, 3  ;;  %v418_v37 = vrot.slane %v375_v33, 4 }
 0x124   :  { %v406_v38 = vsel %vm378_vm0, 0.0, %v390_v34  ;;  %v430_v39 = vmax.f32 %v371_v32, %v414_v35  ;;  %v410_v40 = vsel %vm378_vm0, 0.0, %v394_v36  ;;  %v434_v41 = vmax.f32 %v375_v33, %v418_v37 }
 0x126   :  { %v438_v42 = vmax.f32 %v430_v39, %v406_v38  ;;  %v442_v43 = vmax.f32 %v434_v41, %v410_v40 }
 0x128   :  { %447 = vst.msk [vmem:[#allocation2 + $0xc] sm:$0xf] %vm443_vm1, %v438_v42  ;;  %451 = vst.msk [vmem:[#allocation2 + $0x1c] sm:$0xf] %vm443_vm1, %v442_v43 }
 0x129   :  { %635 = shalt.err (!%p632_p4)
}
 0x12a   :  { %s636_s26 = scalar_lea.hbm %s842_s3, 512 }
 0x12b   :  { %p637_p5 = scmp.ne.s32.totalorder %s842_s3, %s636_s26  ;;  %p640_p6 = scmp.lt.u32.totalorder %s636_s26, %s842_s3 }
 0x12d   :  { %p642_p7 = pnand %p640_p6, %p637_p5 }
 0x12f   :  { %645 = shalt.err (!%p642_p7)
}
 0x130   :  { %s649_s30 = smov 64   ;;  %s650_s4 = smov 4  }
 0x131   :  { %463 = dma.vmem_to_hbm [thread:$0]  %s458_s22, 512, %s842_s3, [#allocation3], %s649_s30, %s649_s30, %s650_s4  }
 0x132   :  { %646 = dma.done.wait [#allocation3], 512  }
 0x133   :  { %647 = vsyncadd [#allocation3], 4294966784 }
 0x134   :  { %467 = vsyncpa [#allocation3], 1 }

</bundles_post_ra>
